<compile_context>
chip_gen: v6e
topology: v6e:2x2x1
jax: 0.10.0
libtpu: 0.0.40
codegen_flags: <defaults>
</compile_context>

<pallas_src>
import jax
import jax.numpy as jnp
from jax.experimental import pallas as pl
from jax.experimental.pallas import tpu as pltpu

LANES = 128  # padded width of the final layer / output slab


def _round_up(n, m):
    return (n + m - 1) // m * m


def mlp_kernel(x_ref,
               w1_ref, b1_ref,
               w2_ref, b2_ref,
               w3_ref, b3_ref,
               w4_ref, b4_ref,
               w5_ref, b5_ref,
               o_ref):
    """(Linear+ReLU) x4 -> Linear, all operands resident in VMEM.

    Weights arrive as bf16; every matmul accumulates in f32. The last layer is
    padded to 128 output lanes so the store is a full, unmasked vst.
    """
    h = x_ref[...].astype(jnp.bfloat16)            # (TB, F) activations in bf16

    def layer(h_bf16, w_ref, b_ref):
        acc = jnp.dot(h_bf16, w_ref[...], preferred_element_type=jnp.float32)
        return jnp.maximum(acc + b_ref[...], 0.0).astype(jnp.bfloat16)

    h = layer(h, w1_ref, b1_ref)
    h = layer(h, w2_ref, b2_ref)
    h = layer(h, w3_ref, b3_ref)
    h = layer(h, w4_ref, b4_ref)

    out = jnp.dot(h, w5_ref[...], preferred_element_type=jnp.float32) + b5_ref[...]
    o_ref[...] = out                               # (TB, 128) f32, lane-dense


def house_price_model(x, params):
    """Runs the fused MLP; returns (B, 1) f32 predictions."""
    B, F = x.shape
    (w1, b1, w2, b2, w3, b3, w4, b4, w5, b5) = params

    # bf16 weights (halve weight DMA bytes); biases stay f32 (tiny, added post-acc).
    # TODO(synk): int8 weight quantization would cut DMA another 2x on v5e/v6e.
    ws = [w.astype(jnp.bfloat16) for w in (w1, w2, w3, w4, w5)]
    bs = [b.astype(jnp.float32) for b in (b1, b2, b3, b4, b5)]

    # Pad the (128, 1) head to 128 lanes: well-shaped MXU op + lane-dense store.
    w5p = jnp.zeros((ws[4].shape[0], LANES), jnp.bfloat16).at[:, :1].set(ws[4])
    b5p = jnp.zeros((1, LANES), jnp.float32).at[:, :1].set(bs[4])

    # Batch tiling: weights resident across the grid, x/out tiles pipelined.
    TB = 256 if B >= 256 else _round_up(max(B, 8), 8)
    B_pad = _round_up(B, TB)
    x_in = jnp.pad(x, ((0, B_pad - B), (0, 0))) if B_pad != B else x
    grid = (B_pad // TB,)

    x_spec = pl.BlockSpec((TB, F), lambda i: (i, 0))
    out_spec = pl.BlockSpec((TB, LANES), lambda i: (i, 0))
    resident = lambda shape: pl.BlockSpec(shape, lambda i: (0, 0))

    operands = [x_in]
    in_specs = [x_spec]
    for w, b in zip(ws[:4] + [w5p], bs[:4] + [b5p]):
        operands += [w, b]
        in_specs += [resident(w.shape), resident(b.shape)]

    out = pl.pallas_call(
        mlp_kernel,
        out_shape=jax.ShapeDtypeStruct((B_pad, LANES), jnp.float32),
        grid=grid,
        in_specs=in_specs,
        out_specs=out_spec,
        compiler_params=pltpu.CompilerParams(
            dimension_semantics=("parallel",),
            vmem_limit_bytes=64 * 1024 * 1024,
        ),
    )(*operands)

    return out[:B, :1]


def init_params(key, input_size):
    """Deterministic init; shapes mirror the PyTorch module (weights as (in, out))."""
    dims = [(input_size, 1024), (1024, 128), (128, 128), (128, 128), (128, 1)]
    params = []
    for fan_in, fan_out in dims:
        kw, kb, key = jax.random.split(key, 3)
        bound = 1.0 / jnp.sqrt(fan_in)
        w = jax.random.uniform(kw, (fan_in, fan_out), jnp.float32, -bound, bound)
        b = jax.random.uniform(kb, (1, fan_out), jnp.float32, -bound, bound)
        params.extend([w, b])
    return tuple(params)


def reference_forward(x, params):
    """f32 reference matching the kernel's bf16-weight / f32-accumulate math."""
    (w1, b1, w2, b2, w3, b3, w4, b4, w5, b5) = params

    def layer(h, w, b, relu=True):
        h = h.astype(jnp.bfloat16).astype(jnp.float32)
        w = w.astype(jnp.bfloat16).astype(jnp.float32)
        out = h @ w + b
        return jnp.maximum(out, 0.0) if relu else out

    h = layer(x, w1, b1)
    h = layer(h, w2, b2)
    h = layer(h, w3, b3)
    h = layer(h, w4, b4)
    return layer(h, w5, b5, relu=False)


if __name__ == "__main__":
    key = jax.random.PRNGKey(0)
    kx, kp = jax.random.split(key)

    batch = 8
    input_size = 32
    x = jax.random.normal(kx, (batch, input_size), jnp.float32)
    params = init_params(kp, input_size)

    out = jax.block_until_ready(house_price_model(x, params))
    ref = reference_forward(x, params)

    assert out.shape == (batch, 1), out.shape
    assert jnp.allclose(out, ref, atol=1e-3, rtol=1e-3), "mismatch vs reference"

    print("KERNEL_OK")
</pallas_src>

<mosaic_0001>
module attributes {stable_mosaic.version = 11 : i64} {
  func.func @mlp_kernel(%arg0: i32, %arg1: memref<8x32xf32, #tpu.memory_space<vmem>>, %arg2: memref<32x1024xbf16, #tpu.memory_space<vmem>>, %arg3: memref<1x1024xf32, #tpu.memory_space<vmem>>, %arg4: memref<1024x128xbf16, #tpu.memory_space<vmem>>, %arg5: memref<1x128xf32, #tpu.memory_space<vmem>>, %arg6: memref<128x128xbf16, #tpu.memory_space<vmem>>, %arg7: memref<1x128xf32, #tpu.memory_space<vmem>>, %arg8: memref<128x128xbf16, #tpu.memory_space<vmem>>, %arg9: memref<1x128xf32, #tpu.memory_space<vmem>>, %arg10: memref<128x128xbf16, #tpu.memory_space<vmem>>, %arg11: memref<1x128xf32, #tpu.memory_space<vmem>>, %arg12: memref<8x128xf32, #tpu.memory_space<vmem>>) attributes {dimension_semantics = [#tpu.dimension_semantics<parallel>], iteration_bounds = array<i64: 1>, scalar_prefetch = 0 : i64, scratch_operands = 0 : i64, tpu.core_type = #tpu.core_type<tc>, window_params = [{transform_indices = @transform_0, window_bounds = array<i64: 8, 32>}, {pipeline_mode = #tpu.pipeline_mode<synchronous>, transform_indices = @transform_1, window_bounds = array<i64: 32, 1024>}, {pipeline_mode = #tpu.pipeline_mode<synchronous>, transform_indices = @transform_2, window_bounds = array<i64: 1, 1024>}, {pipeline_mode = #tpu.pipeline_mode<synchronous>, transform_indices = @transform_3, window_bounds = array<i64: 1024, 128>}, {pipeline_mode = #tpu.pipeline_mode<synchronous>, transform_indices = @transform_4, window_bounds = array<i64: 1, 128>}, {pipeline_mode = #tpu.pipeline_mode<synchronous>, transform_indices = @transform_5, window_bounds = array<i64: 128, 128>}, {pipeline_mode = #tpu.pipeline_mode<synchronous>, transform_indices = @transform_6, window_bounds = array<i64: 1, 128>}, {pipeline_mode = #tpu.pipeline_mode<synchronous>, transform_indices = @transform_7, window_bounds = array<i64: 128, 128>}, {pipeline_mode = #tpu.pipeline_mode<synchronous>, transform_indices = @transform_8, window_bounds = array<i64: 1, 128>}, {pipeline_mode = #tpu.pipeline_mode<synchronous>, transform_indices = @transform_9, window_bounds = array<i64: 128, 128>}, {pipeline_mode = #tpu.pipeline_mode<synchronous>, transform_indices = @transform_10, window_bounds = array<i64: 1, 128>}, {transform_indices = @transform_11, window_bounds = array<i64: 8, 128>}]} {
    %c0 = arith.constant 0 : index
    %c0_0 = arith.constant 0 : index
    %0 = vector.load %arg1[%c0, %c0_0] : memref<8x32xf32, #tpu.memory_space<vmem>>, vector<8x32xf32>
    %1 = arith.truncf %0 : vector<8x32xf32> to vector<8x32xbf16>
    %c0_1 = arith.constant 0 : index
    %c0_2 = arith.constant 0 : index
    %2 = vector.load %arg2[%c0_1, %c0_2] : memref<32x1024xbf16, #tpu.memory_space<vmem>>, vector<32x1024xbf16>
    %cst = arith.constant dense<0.000000e+00> : vector<8x1024xf32>
    %3 = tpu.matmul %1, %2, %cst {dimension_numbers = #tpu.dot_dimension_numbers<[1], [0], [0], [1], [0, 0, 1, 1], [], []>} : vector<8x32xbf16>, vector<32x1024xbf16>, vector<8x1024xf32> -> vector<8x1024xf32>
    %c0_3 = arith.constant 0 : index
    %c0_4 = arith.constant 0 : index
    %4 = vector.load %arg3[%c0_3, %c0_4] : memref<1x1024xf32, #tpu.memory_space<vmem>>, vector<1x1024xf32>
    %5 = vector.broadcast %4 : vector<1x1024xf32> to vector<8x1024xf32>
    %6 = arith.addf %3, %5 : vector<8x1024xf32>
    %cst_5 = arith.constant 0.000000e+00 : f32
    %7 = vector.broadcast %cst_5 : f32 to vector<8x1024xf32>
    %8 = arith.maximumf %6, %7 : vector<8x1024xf32>
    %9 = arith.truncf %8 : vector<8x1024xf32> to vector<8x1024xbf16>
    %c0_6 = arith.constant 0 : index
    %c0_7 = arith.constant 0 : index
    %10 = vector.load %arg4[%c0_6, %c0_7] : memref<1024x128xbf16, #tpu.memory_space<vmem>>, vector<1024x128xbf16>
    %cst_8 = arith.constant dense<0.000000e+00> : vector<8x128xf32>
    %11 = tpu.matmul %9, %10, %cst_8 {dimension_numbers = #tpu.dot_dimension_numbers<[1], [0], [0], [1], [0, 0, 1, 1], [], []>} : vector<8x1024xbf16>, vector<1024x128xbf16>, vector<8x128xf32> -> vector<8x128xf32>
    %c0_9 = arith.constant 0 : index
    %c0_10 = arith.constant 0 : index
    %12 = vector.load %arg5[%c0_9, %c0_10] : memref<1x128xf32, #tpu.memory_space<vmem>>, vector<1x128xf32>
    %13 = vector.broadcast %12 : vector<1x128xf32> to vector<8x128xf32>
    %14 = arith.addf %11, %13 : vector<8x128xf32>
    %cst_11 = arith.constant 0.000000e+00 : f32
    %15 = vector.broadcast %cst_11 : f32 to vector<8x128xf32>
    %16 = arith.maximumf %14, %15 : vector<8x128xf32>
    %17 = arith.truncf %16 : vector<8x128xf32> to vector<8x128xbf16>
    %c0_12 = arith.constant 0 : index
    %c0_13 = arith.constant 0 : index
    %18 = vector.load %arg6[%c0_12, %c0_13] : memref<128x128xbf16, #tpu.memory_space<vmem>>, vector<128x128xbf16>
    %cst_14 = arith.constant dense<0.000000e+00> : vector<8x128xf32>
    %19 = tpu.matmul %17, %18, %cst_14 {dimension_numbers = #tpu.dot_dimension_numbers<[1], [0], [0], [1], [0, 0, 1, 1], [], []>} : vector<8x128xbf16>, vector<128x128xbf16>, vector<8x128xf32> -> vector<8x128xf32>
    %c0_15 = arith.constant 0 : index
    %c0_16 = arith.constant 0 : index
    %20 = vector.load %arg7[%c0_15, %c0_16] : memref<1x128xf32, #tpu.memory_space<vmem>>, vector<1x128xf32>
    %21 = vector.broadcast %20 : vector<1x128xf32> to vector<8x128xf32>
    %22 = arith.addf %19, %21 : vector<8x128xf32>
    %cst_17 = arith.constant 0.000000e+00 : f32
    %23 = vector.broadcast %cst_17 : f32 to vector<8x128xf32>
    %24 = arith.maximumf %22, %23 : vector<8x128xf32>
    %25 = arith.truncf %24 : vector<8x128xf32> to vector<8x128xbf16>
    %c0_18 = arith.constant 0 : index
    %c0_19 = arith.constant 0 : index
    %26 = vector.load %arg8[%c0_18, %c0_19] : memref<128x128xbf16, #tpu.memory_space<vmem>>, vector<128x128xbf16>
    %cst_20 = arith.constant dense<0.000000e+00> : vector<8x128xf32>
    %27 = tpu.matmul %25, %26, %cst_20 {dimension_numbers = #tpu.dot_dimension_numbers<[1], [0], [0], [1], [0, 0, 1, 1], [], []>} : vector<8x128xbf16>, vector<128x128xbf16>, vector<8x128xf32> -> vector<8x128xf32>
    %c0_21 = arith.constant 0 : index
    %c0_22 = arith.constant 0 : index
    %28 = vector.load %arg9[%c0_21, %c0_22] : memref<1x128xf32, #tpu.memory_space<vmem>>, vector<1x128xf32>
    %29 = vector.broadcast %28 : vector<1x128xf32> to vector<8x128xf32>
    %30 = arith.addf %27, %29 : vector<8x128xf32>
    %cst_23 = arith.constant 0.000000e+00 : f32
    %31 = vector.broadcast %cst_23 : f32 to vector<8x128xf32>
    %32 = arith.maximumf %30, %31 : vector<8x128xf32>
    %33 = arith.truncf %32 : vector<8x128xf32> to vector<8x128xbf16>
    %c0_24 = arith.constant 0 : index
    %c0_25 = arith.constant 0 : index
    %34 = vector.load %arg10[%c0_24, %c0_25] : memref<128x128xbf16, #tpu.memory_space<vmem>>, vector<128x128xbf16>
    %cst_26 = arith.constant dense<0.000000e+00> : vector<8x128xf32>
    %35 = tpu.matmul %33, %34, %cst_26 {dimension_numbers = #tpu.dot_dimension_numbers<[1], [0], [0], [1], [0, 0, 1, 1], [], []>} : vector<8x128xbf16>, vector<128x128xbf16>, vector<8x128xf32> -> vector<8x128xf32>
    %c0_27 = arith.constant 0 : index
    %c0_28 = arith.constant 0 : index
    %36 = vector.load %arg11[%c0_27, %c0_28] : memref<1x128xf32, #tpu.memory_space<vmem>>, vector<1x128xf32>
    %37 = vector.broadcast %36 : vector<1x128xf32> to vector<8x128xf32>
    %38 = arith.addf %35, %37 : vector<8x128xf32>
    %c0_29 = arith.constant 0 : index
    %c0_30 = arith.constant 0 : index
    %39 = vector.load %arg12[%c0_29, %c0_30] : memref<8x128xf32, #tpu.memory_space<vmem>>, vector<8x128xf32>
    tpu.vector_store %arg12[%c0_29, %c0_30], %38 {strides = array<i32>} : memref<8x128xf32, #tpu.memory_space<vmem>>, vector<8x128xf32>,
    return
  }
  func.func @transform_0(%arg0: i32) -> (i32, i32) {
    %c0_i32 = arith.constant 0 : i32
    %c0_i32_0 = arith.constant 0 : i32
    return %arg0, %c0_i32 : i32, i32
  }
  func.func @transform_1(%arg0: i32) -> (i32, i32) {
    %c0_i32 = arith.constant 0 : i32
    %c0_i32_0 = arith.constant 0 : i32
    %c0_i32_1 = arith.constant 0 : i32
    return %c0_i32, %c0_i32_0 : i32, i32
  }
  func.func @transform_2(%arg0: i32) -> (i32, i32) {
    %c0_i32 = arith.constant 0 : i32
    %c0_i32_0 = arith.constant 0 : i32
    %c0_i32_1 = arith.constant 0 : i32
    return %c0_i32, %c0_i32_0 : i32, i32
  }
  func.func @transform_3(%arg0: i32) -> (i32, i32) {
    %c0_i32 = arith.constant 0 : i32
    %c0_i32_0 = arith.constant 0 : i32
    %c0_i32_1 = arith.constant 0 : i32
    return %c0_i32, %c0_i32_0 : i32, i32
  }
  func.func @transform_4(%arg0: i32) -> (i32, i32) {
    %c0_i32 = arith.constant 0 : i32
    %c0_i32_0 = arith.constant 0 : i32
    %c0_i32_1 = arith.constant 0 : i32
    return %c0_i32, %c0_i32_0 : i32, i32
  }
  func.func @transform_5(%arg0: i32) -> (i32, i32) {
    %c0_i32 = arith.constant 0 : i32
    %c0_i32_0 = arith.constant 0 : i32
    %c0_i32_1 = arith.constant 0 : i32
    return %c0_i32, %c0_i32_0 : i32, i32
  }
  func.func @transform_6(%arg0: i32) -> (i32, i32) {
    %c0_i32 = arith.constant 0 : i32
    %c0_i32_0 = arith.constant 0 : i32
    %c0_i32_1 = arith.constant 0 : i32
    return %c0_i32, %c0_i32_0 : i32, i32
  }
  func.func @transform_7(%arg0: i32) -> (i32, i32) {
    %c0_i32 = arith.constant 0 : i32
    %c0_i32_0 = arith.constant 0 : i32
    %c0_i32_1 = arith.constant 0 : i32
    return %c0_i32, %c0_i32_0 : i32, i32
  }
  func.func @transform_8(%arg0: i32) -> (i32, i32) {
    %c0_i32 = arith.constant 0 : i32
    %c0_i32_0 = arith.constant 0 : i32
    %c0_i32_1 = arith.constant 0 : i32
    return %c0_i32, %c0_i32_0 : i32, i32
  }
  func.func @transform_9(%arg0: i32) -> (i32, i32) {
    %c0_i32 = arith.constant 0 : i32
    %c0_i32_0 = arith.constant 0 : i32
    %c0_i32_1 = arith.constant 0 : i32
    return %c0_i32, %c0_i32_0 : i32, i32
  }
  func.func @transform_10(%arg0: i32) -> (i32, i32) {
    %c0_i32 = arith.constant 0 : i32
    %c0_i32_0 = arith.constant 0 : i32
    %c0_i32_1 = arith.constant 0 : i32
    return %c0_i32, %c0_i32_0 : i32, i32
  }
  func.func @transform_11(%arg0: i32) -> (i32, i32) {
    %c0_i32 = arith.constant 0 : i32
    %c0_i32_0 = arith.constant 0 : i32
    return %arg0, %c0_i32 : i32, i32
  }
}

</mosaic_0001>

<bundles_post_ra>
// kernel: tpu_custom_call.1
= control target key start
LH: loop header
LB: loop body
LE: loop exit
PB: predicated region body
PF: predicated region fallthrough
CT: control target
= control target key end

     0   :  { %16 = vsyncpa [#allocation3], 0  ;;  %s2239_s0 = inlined_call_operand.hbm [shape: f32[8,32], index: 0, kind: input, shape index: {}]   ;;  %s2240_s1 = inlined_call_operand.hbm [shape: bf16[32,1024], index: 1, kind: input, shape index: {}]   ;;  %s2241_s2 = inlined_call_operand.hbm [shape: f32[1,1024], index: 2, kind: input, shape index: {}]   ;;  %s2242_s3 = inlined_call_operand.hbm [shape: bf16[1024,128], index: 3, kind: input, shape index: {}]   ;;  %s2243_s4 = inlined_call_operand.vmem [shape: f32[1,128], index: 4, kind: input, shape index: {}]   ;;  %s2244_s5 = inlined_call_operand.hbm [shape: bf16[128,128], index: 5, kind: input, shape index: {}]   ;;  %s2245_s6 = inlined_call_operand.vmem [shape: f32[1,128], index: 6, kind: input, shape index: {}]   ;;  %s2246_s7 = inlined_call_operand.hbm [shape: bf16[128,128], index: 7, kind: input, shape index: {}]   ;;  %s2247_s8 = inlined_call_operand.vmem [shape: f32[1,128], index: 8, kind: input, shape index: {}]   ;;  %s2248_s9 = inlined_call_operand.hbm [shape: bf16[128,128], index: 9, kind: input, shape index: {}]   ;;  %s2249_s10 = inlined_call_operand.vmem [shape: f32[1,128], index: 10, kind: input, shape index: {}]   ;;  %s2250_s11 = inlined_call_operand.hbm [shape: f32[8,128], index: 11, kind: output, shape index: {}]  }
   0x1   :  { %17 = vsyncpa [#allocation6], 0 }
   0x2   :  { %18 = vsyncpa [#allocation9], 0 }
   0x3   :  { %19 = vsyncpa [#allocation12], 0 }
   0x4   :  { %20 = vsyncpa [#allocation4], 0  ;;  %s2052_s17 = smov [#allocation5]  }
   0x5   :  { %s36_s18 = sshll.u32 %s2052_s17, 4  ;;  %s37_s18 = int_to_ptr.vmem [resolvable:$true] %s36_s18 }
   0x6   :  { %s1890_s19 = scalar_lea.vmem %s37_s18, 2048  ;;  %p1895_p1 = scmp.lt.s32.totalorder %s37_s18, %s37_s18 }
   0x7   :  { %p1891_p0 = scmp.ne.s32.totalorder %s37_s18, %s1890_s19  ;;  %p1896_p2 = scmp.lt.s32.totalorder %s1890_s19, %s1890_s19 }
   0x9   :  { %p1897_p3 = por %p1896_p2, %p1895_p1 }
   0xb   :  { %p1898_p4 = pnand %p1897_p3, %p1891_p0 }
   0xd   :  { %1901 = shalt.err (!%p1898_p4)
}
   0xe   :  { %s2053_s20 = smov 512   ;;  %s2054_s21 = smov 32  }
   0xf   :  { %42 = dma.hbm_to_vmem [thread:$0]  %s2240_s1, 2048, %s37_s18, [#allocation6], %s2053_s20, %s2053_s20, %s2054_s21  }
  0x10   :  { %s2055_s24 = smov [#allocation8]  }
  0x11   :  { %s58_s25 = sshll.u32 %s2055_s24, 4  ;;  %s59_s25 = int_to_ptr.vmem [resolvable:$true] %s58_s25 }
  0x12   :  { %s1910_s26 = scalar_lea.vmem %s59_s25, 8192  ;;  %p1915_p6 = scmp.lt.s32.totalorder %s59_s25, %s59_s25 }
  0x13   :  { %p1911_p5 = scmp.ne.s32.totalorder %s59_s25, %s1910_s26  ;;  %p1916_p7 = scmp.lt.s32.totalorder %s1910_s26, %s1910_s26 }
  0x15   :  { %p1917_p8 = por %p1916_p7, %p1915_p6 }
  0x17   :  { %p1918_p9 = pnand %p1917_p8, %p1911_p5 }
  0x19   :  { %1921 = shalt.err (!%p1918_p9)
}
  0x1a   :  { %s2056_s27 = smov 64   ;;  %s2057_s28 = smov 4  }
  0x1b   :  { %64 = dma.hbm_to_vmem [thread:$0]  %s2242_s3, 8192, %s59_s25, [#allocation9], %s2056_s27, %s2056_s27, %s2057_s28  }
  0x1c   :  { %s2058_s1 = smov [#allocation11]   ;;  %s2059_s13 = smov [#allocation2]  }
  0x1d   :  { %s86_s12 = sshll.u32 %s2058_s1, 4  ;;  %s27_s14 = sshll.u32 %s2059_s13, 4  ;;  %s87_s12 = int_to_ptr.vmem [resolvable:$true] %s86_s12  ;;  %s28_s14 = int_to_ptr.vmem [resolvable:$true] %s27_s14 }
  0x1e   :  { %s1930_s15 = scalar_lea.vmem %s87_s12, 1024  ;;  %p1935_p11 = scmp.lt.s32.totalorder %s87_s12, %s87_s12 }
  0x1f   :  { %p1931_p10 = scmp.ne.s32.totalorder %s87_s12, %s1930_s15  ;;  %p1936_p12 = scmp.lt.s32.totalorder %s1930_s15, %s1930_s15 }
  0x21   :  { %p1937_p13 = por %p1936_p12, %p1935_p11 }
  0x23   :  { %p1938_p0 = pnand %p1937_p13, %p1931_p10 }
  0x25   :  { %1941 = shalt.err (!%p1938_p0)
}
  0x26   :  { %92 = dma.hbm_to_vmem [thread:$0]  %s2246_s7, 1024, %s87_s12, [#allocation12], %s2056_s27, %s2056_s27, %s2057_s28  }
  0x27   :  { %s1950_s3 = scalar_lea.vmem %s28_s14, 128  ;;  %p1955_p2 = scmp.lt.s32.totalorder %s28_s14, %s28_s14 }
  0x28   :  { %p1951_p1 = scmp.ne.s32.totalorder %s28_s14, %s1950_s3  ;;  %p1956_p3 = scmp.lt.s32.totalorder %s1950_s3, %s1950_s3 }
  0x2a   :  { %p1957_p4 = por %p1956_p3, %p1955_p2 }
  0x2c   :  { %p1958_p5 = pnand %p1957_p4, %p1951_p1 }
  0x2e   :  { %1961 = shalt.err (!%p1958_p5)
}
  0x2f   :  { %30 = dma.hbm_to_vmem [thread:$0]  %s2239_s0, 128, %s28_s14, [#allocation3]  }
  0x30   :  { %s2060_s20 = smov [#allocation7]   ;;  %s2061_s22 = smov [#allocation10]  }
  0x31   :  { %s49_s21 = sshll.u32 %s2060_s20, 4  ;;  %s72_s23 = sshll.u32 %s2061_s22, 4  ;;  %s50_s21 = int_to_ptr.vmem [resolvable:$true] %s49_s21  ;;  %s73_s23 = int_to_ptr.vmem [resolvable:$true] %s72_s23 }
  0x32   :  { %s1970_s24 = scalar_lea.vmem %s50_s21, 128  ;;  %p1975_p7 = scmp.lt.s32.totalorder %s50_s21, %s50_s21 }
  0x33   :  { %p1971_p6 = scmp.ne.s32.totalorder %s50_s21, %s1970_s24  ;;  %p1976_p8 = scmp.lt.s32.totalorder %s1970_s24, %s1970_s24 }
  0x35   :  { %p1977_p9 = por %p1976_p8, %p1975_p7 }
  0x37   :  { %p1978_p10 = pnand %p1977_p9, %p1971_p6 }
  0x39   :  { %1981 = shalt.err (!%p1978_p10)
}
  0x3a   :  { %52 = dma.hbm_to_vmem [thread:$0]  %s2241_s2, 128, %s50_s21, [#allocation6]  }
  0x3b   :  { %s1990_s26 = scalar_lea.vmem %s73_s23, 1024  ;;  %p1995_p12 = scmp.lt.s32.totalorder %s73_s23, %s73_s23 }
  0x3c   :  { %p1991_p11 = scmp.ne.s32.totalorder %s73_s23, %s1990_s26  ;;  %p1996_p13 = scmp.lt.s32.totalorder %s1990_s26, %s1990_s26 }
  0x3e   :  { %p1997_p0 = por %p1996_p13, %p1995_p12 }
  0x40   :  { %p1998_p1 = pnand %p1997_p0, %p1991_p11 }
  0x42   :  { %2001 = shalt.err (!%p1998_p1)
}
  0x43   :  { %78 = dma.hbm_to_vmem [thread:$0]  %s2244_s5, 1024, %s73_s23, [#allocation9], %s2056_s27, %s2056_s27, %s2057_s28  }
  0x44   :  { %s2062_s30 = smov [#allocation13]  }
  0x45   :  { %s100_s1 = sshll.u32 %s2062_s30, 4  ;;  %s101_s1 = int_to_ptr.vmem [resolvable:$true] %s100_s1 }
  0x46   :  { %s2010_s12 = scalar_lea.vmem %s101_s1, 1024  ;;  %p2015_p3 = scmp.lt.s32.totalorder %s101_s1, %s101_s1 }
  0x47   :  { %p2011_p2 = scmp.ne.s32.totalorder %s101_s1, %s2010_s12  ;;  %p2016_p4 = scmp.lt.s32.totalorder %s2010_s12, %s2010_s12 }
  0x49   :  { %p2017_p5 = por %p2016_p4, %p2015_p3 }
  0x4b   :  { %p2018_p6 = pnand %p2017_p5, %p2011_p2 }
  0x4d   :  { %2021 = shalt.err (!%p2018_p6)
}
  0x4e   :  { %106 = dma.hbm_to_vmem [thread:$0]  %s2248_s9, 1024, %s101_s1, [#allocation12], %s2056_s27, %s2056_s27, %s2057_s28  }
  0x4f   :  { %2042 = dma.done.wait [#allocation3], 128  }
  0x50   :  { %2043 = vsyncadd [#allocation3], 4294967168 }
  0x51   :  { %2044 = dma.done.wait [#allocation6], 2176  }
  0x52   :  { %2045 = vsyncadd [#allocation6], 4294965120 }
  0x53   :  { %2046 = dma.done.wait [#allocation9], 9216  }
  0x54   :  { %2047 = vsyncadd [#allocation9], 4294958080 }
  0x55   :  { %2048 = dma.done.wait [#allocation12], 2048  }
  0x56   :  { %2049 = vsyncadd [#allocation12], 4294965248  ;;  %v2063_v0 = vmov 0   ;;  %v141_v1 = vld [vmem:[#allocation5 + $0x40] sm:$0xff]  ;;  %v142_v8 = vld [vmem:[#allocation5 + $0x48] sm:$0xff]  ;;  %vm271_vm0 = vcmask 261120  }
  0x57   :  { %307 = vmatprep.mubr.bf16.mxu1 %v2063_v0  ;;  %v145_v2 = vld [vmem:[#allocation5 + $0x60] sm:$0xff]  ;;  %v146_v9 = vld [vmem:[#allocation5 + $0x68] sm:$0xff]  ;;  %v131_v11 = vld [vmem:[#allocation2] sm:$0xff]  ;;  %vm2065_vm1 = vmmov 0   ;;  %s2066_s16 = smov [#allocation14]  }
  0x58   :  { %v133_v3 = vld [vmem:[#allocation5] sm:$0xff]  ;;  %v1501_v4 = vcombine.high %v141_v1, %v145_v2  ;;  %v1500_v5 = vcombine.low %v141_v1, %v145_v2  ;;  %v1503_v12 = vcombine.high %v142_v8, %v146_v9  ;;  %v134_v13 = vld [vmem:[#allocation5 + $0x8] sm:$0xff]  ;;  %v2161_v16 = vpack.c.bf16 %v131_v11, %v131_v11  ;;  %v143_v19 = vld [vmem:[#allocation5 + $0x50] sm:$0xff]  ;;  %s1480_s17 = sshll.u32 %s2066_s16, 4  ;;  %s1481_s17 = int_to_ptr.vmem [resolvable:$true] %s1480_s17 }
  0x59   :  { %v137_v6 = vld [vmem:[#allocation5 + $0x20] sm:$0xff]  ;;  %v138_v14 = vld [vmem:[#allocation5 + $0x28] sm:$0xff]  ;;  %v1502_v18 = vcombine.low %v142_v8, %v146_v9  ;;  %v147_v20 = vld [vmem:[#allocation5 + $0x70] sm:$0xff]  ;;  %p2027_p8 = scmp.lt.s32.totalorder %s1481_s17, %s1481_s17 }
  0x5a   :  { %v1493_v7 = vcombine.high %v133_v3, %v137_v6  ;;  %287 = vmatprep.subr.bf16.mxu1 %v1501_v4  ;;  %v1492_v10 = vcombine.low %v133_v3, %v137_v6  ;;  %v1794_v15 = vld [vmem:[#allocation8 + $0x78] sm:$0xff]   ;;  %v1796_v21 = vld [vmem:[#allocation8 + $0x70] sm:$0xff]   ;;  %v1495_v22 = vcombine.high %v134_v13, %v138_v14  ;;  %v1798_v24 = vld [vmem:[#allocation8 + $0x68] sm:$0xff]   ;;  %v1494_v25 = vcombine.low %v134_v13, %v138_v14 }
  0x5b   :  { %288 = vmatpush1.bf16.msra.mxu1 %v1500_v5  ;;  %v1795_v17 = vld [vmem:[#allocation8 + $0x38] sm:$0xff]   ;;  %1604 = vmatprep.subr.bf16.mxu0 %v1794_v15  ;;  %v1797_v23 = vld [vmem:[#allocation8 + $0x30] sm:$0xff]   ;;  %v135_v26 = vld [vmem:[#allocation5 + $0x10] sm:$0xff]  ;;  %v1505_v28 = vcombine.high %v143_v19, %v147_v20  ;;  %v1504_v31 = vcombine.low %v143_v19, %v147_v20  ;;  %v151_v5 = vlaneseq }
  0x5c   :  { %289 = vmatprep.subr.bf16.mxu1 %v1493_v7  ;;  %1605 = vmatpush3.bf16.msra.mxu0 %v1795_v17  ;;  %v139_v27 = vld [vmem:[#allocation5 + $0x30] sm:$0xff]  ;;  %v1802_v30 = vld [vmem:[#allocation8 + $0x60] sm:$0xff]   ;;  %v144_v32 = vld [vmem:[#allocation5 + $0x58] sm:$0xff] }
  0x5d   :  { %1606 = vmatprep.subr.bf16.mxu0 %v1796_v21  ;;  %v1800_v29 = vld [vmem:[#allocation8 + $0x28] sm:$0xff]   ;;  %v148_v33 = vld [vmem:[#allocation5 + $0x78] sm:$0xff]  ;;  %v1497_v34 = vcombine.high %v135_v26, %v139_v27  ;;  %v1804_v35 = vld [vmem:[#allocation8 + $0x20] sm:$0xff]   ;;  %v1496_v37 = vcombine.low %v135_v26, %v139_v27  ;;  %v2174_v6 = vshrl.u32 %v151_v5, 7 }
  0x5e   :  { %v1806_v36 = vld [vmem:[#allocation8 + $0x58] sm:$0xff]   ;;  %v136_v38 = vld [vmem:[#allocation5 + $0x18] sm:$0xff]  ;;  %v1507_v40 = vcombine.high %v144_v32, %v148_v33  ;;  %v1506_v43 = vcombine.low %v144_v32, %v148_v33  ;;  %v1807_v51 = vld [vmem:[#allocation8 + $0xe8] sm:$0xff]  }
  0x5f   :  { %290 = vmatpush1.bf16.msra.mxu1 %v1492_v10  ;;  %v140_v39 = vld [vmem:[#allocation5 + $0x38] sm:$0xff]  ;;  %v1808_v41 = vld [vmem:[#allocation8 + $0x18] sm:$0xff]   ;;  %v1809_v52 = vld [vmem:[#allocation8 + $0xa8] sm:$0xff]   ;;  %v153_v7 = vsub.s32 0, %v2174_v6  ;;  %v157_v9 = vsub.s32 1, %v2174_v6  ;;  %v161_v14 = vsub.s32 2, %v2174_v6 }
  0x60   :  { %328 = vmatprep.subr.bf16.mxu1 %v1503_v12  ;;  %1607 = vmatpush3.bf16.msra.mxu0 %v1797_v23  ;;  %v1810_v42 = vld [vmem:[#allocation8 + $0x50] sm:$0xff]   ;;  %v1499_v44 = vcombine.high %v136_v38, %v140_v39  ;;  %v1799_v46 = vld [vmem:[#allocation8 + $0xf8] sm:$0xff]   ;;  %v1498_v47 = vcombine.low %v136_v38, %v140_v39  ;;  %v1811_v53 = vld [vmem:[#allocation8 + $0xe0] sm:$0xff]   ;;  %v165_v17 = vsub.s32 3, %v2174_v6  ;;  %v173_v33 = vsub.s32 5, %v2174_v6 }
  0x61   :  { %1608 = vmatprep.subr.bf16.mxu0 %v1798_v24  ;;  %v1812_v45 = vld [vmem:[#allocation8 + $0x10] sm:$0xff]   ;;  %v1801_v48 = vld [vmem:[#allocation8 + $0xb8] sm:$0xff]   ;;  %v1813_v54 = vld [vmem:[#allocation8 + $0xa0] sm:$0xff]  }
  0x62   :  { %1508 = vmatmul.mubr.msk.bf16.vlgmr.msra.gmra.mxu1 %vm271_vm0, %v2161_v16  ;;  %v1803_v49 = vld [vmem:[#allocation8 + $0xf0] sm:$0xff]   ;;  %v1814_v55 = vld [vmem:[#allocation8 + $0x48] sm:$0xff]   ;;  %v1815_v56 = vld [vmem:[#allocation8 + $0xd8] sm:$0xff]  }
  0x63   :  { %329 = vmatpush1.bf16.msra.mxu1 %v1502_v18  ;;  %348 = vmatprep.mubr.bf16.mxu1 %v2063_v0  ;;  %v1805_v50 = vld [vmem:[#allocation8 + $0xb0] sm:$0xff]   ;;  %v1816_v57 = vld [vmem:[#allocation8 + $0x8] sm:$0xff]   ;;  %v1817_v58 = vld [vmem:[#allocation8 + $0x98] sm:$0xff]  }
  0x64   :  { %330 = vmatprep.subr.bf16.mxu1 %v1495_v22  ;;  %1609 = vmatpush3.bf16.msra.mxu0 %v1800_v29  ;;  %v1818_v59 = vld [vmem:[#allocation8 + $0x40] sm:$0xff]   ;;  %v1819_v60 = vld [vmem:[#allocation8 + $0xd0] sm:$0xff]   ;;  %v1822_v63 = vld [vmem:[#allocation8 + $0xc8] sm:$0xff]  }
  0x65   :  { %1610 = vmatprep.subr.bf16.mxu0 %v1802_v30  ;;  %v1820_v61 = vld [vmem:[#allocation8] sm:$0xff]   ;;  %v1821_v62 = vld [vmem:[#allocation8 + $0x90] sm:$0xff]   ;;  %v1824_v1 = vld [vmem:[#allocation8 + $0x88] sm:$0xff]  }
  0x66   :  { %v1826_v2 = vld [vmem:[#allocation8 + $0xc0] sm:$0xff]   ;;  %v1831_v4 = vld [vmem:[#allocation8 + $0x1f8] sm:$0xff]   ;;  %v1829_v32 = vld [vmem:[#allocation8 + $0x130] sm:$0xff]  }
  0x67   :  { %331 = vmatpush1.bf16.msra.mxu1 %v1494_v25  ;;  %v1828_v3 = vld [vmem:[#allocation8 + $0x80] sm:$0xff]   ;;  %v2177_v8 = vld [vmem:[#allocation7] sm:$0xff] }
  0x68   :  { %369 = vmatprep.subr.bf16.mxu1 %v1505_v28  ;;  %1611 = vmatpush3.bf16.msra.mxu0 %v1804_v35  ;;  %v154_v10 = vrot.slane %v2177_v8, %v153_v7  ;;  %v158_v11 = vrot.slane %v2177_v8, %v157_v9  ;;  %v162_v20 = vrot.slane %v2177_v8, %v161_v14  ;;  %v1825_v25 = vld [vmem:[#allocation8 + $0x138] sm:$0xff]   ;;  %v1827_v28 = vld [vmem:[#allocation8 + $0x170] sm:$0xff]   ;;  %v1846_v7 = vld [vmem:[#allocation8 + $0x148] sm:$0xff]  }
  0x69   :  { %1612 = vmatprep.subr.bf16.mxu0 %v1806_v36  ;;  %v166_v24 = vrot.slane %v2177_v8, %v165_v17  ;;  %v1830_v36 = vld [vmem:[#allocation8 + $0x168] sm:$0xff]   ;;  %v1847_v9 = vld [vmem:[#allocation8 + $0x1d8] sm:$0xff]   ;;  %v177_v17 = vsub.s32 6, %v2174_v6 }
  0x6a   :  { %1509 = vmatmul.mubr.msk.bf16.vlgmr.msra.gmra.mxu1 %vm271_vm0, %v2161_v16  ;;  %v1849_v14 = vld [vmem:[#allocation8 + $0x198] sm:$0xff]  }
  0x6b   :  { %370 = vmatpush1.bf16.msra.mxu1 %v1504_v31  ;;  %389 = vmatprep.mubr.bf16.mxu1 %v2063_v0 }
  0x6c   :  { %371 = vmatprep.subr.bf16.mxu1 %v1497_v34  ;;  %1613 = vmatpush3.bf16.msra.mxu0 %v1808_v41  ;;  %v1833_v41 = vld [vmem:[#allocation8 + $0x1b8] sm:$0xff]  }
  0x6d   :  { %1614 = vmatprep.subr.bf16.mxu0 %v1810_v42  ;;  %v174_v42 = vrot.slane %v2177_v8, %v173_v33  ;;  %v1860_v33 = vld [vmem:[#allocation10 + $0x28] sm:$0xff]  }
  0x6f   :  { %372 = vmatpush1.bf16.msra.mxu1 %v1496_v37 }
  0x70   :  { %410 = vmatprep.subr.bf16.mxu1 %v1507_v40  ;;  %1615 = vmatpush3.bf16.msra.mxu0 %v1812_v45  ;;  %v1832_v40 = vld [vmem:[#allocation8 + $0x128] sm:$0xff]   ;;  %v1835_v45 = vld [vmem:[#allocation8 + $0x1f0] sm:$0xff]  }
  0x71   :  { %1616 = vmatprep.subr.bf16.mxu0 %v1814_v55 }
  0x72   :  { %1510 = vmatmul.mubr.msk.bf16.vlgmr.msra.gmra.mxu1 %vm271_vm0, %v2161_v16 }
  0x73   :  { %411 = vmatpush1.bf16.msra.mxu1 %v1506_v43  ;;  %430 = vmatprep.mubr.bf16.mxu1 %v2063_v0  ;;  %v1823_v0 = vld [vmem:[#allocation8 + $0x178] sm:$0xff]  }
  0x74   :  { %412 = vmatprep.subr.bf16.mxu1 %v1499_v44  ;;  %1617 = vmatpush3.bf16.msra.mxu0 %v1816_v57  ;;  %v1834_v44 = vld [vmem:[#allocation8 + $0x160] sm:$0xff]   ;;  %v1840_v57 = vld [vmem:[#allocation8 + $0x118] sm:$0xff]  }
  0x75   :  { %1618 = vmatprep.subr.bf16.mxu0 %v1818_v59 }
  0x77   :  { %413 = vmatpush1.bf16.msra.mxu1 %v1498_v47 }
  0x78   :  { %1626 = vmatprep.subr.bf16.mxu1 %v1799_v46  ;;  %1619 = vmatpush3.bf16.msra.mxu0 %v1820_v61  ;;  %v169_v61 = vsub.s32 4, %v2174_v6 }
  0x79   :  { %1648 = vmatprep.subr.bf16.mxu0 %v1823_v0 }
  0x7a   :  { %1511 = vmatmul.mubr.msk.bf16.vlgmr.msra.gmra.mxu1 %vm271_vm0, %v2161_v16  ;;  %v170_v5 = vrot.slane %v2177_v8, %v169_v61 }
  0x7b   :  { %1627 = vmatpush3.bf16.msra.mxu1 %v1801_v48  ;;  %v1836_v48 = vld [vmem:[#allocation8 + $0x120] sm:$0xff]  }
  0x7c   :  { %1628 = vmatprep.subr.bf16.mxu1 %v1803_v49  ;;  %v1837_v49 = vld [vmem:[#allocation8 + $0x1b0] sm:$0xff]  }
  0x7f   :  { %1629 = vmatpush3.bf16.msra.mxu1 %v1805_v50 }
  0x80   :  { %1630 = vmatprep.subr.bf16.mxu1 %v1807_v51  ;;  %v181_v51 = vsub.s32 7, %v2174_v6  ;;  %v1856_v6 = vld [vmem:[#allocation8 + $0x1c0] sm:$0xff]  }
  0x83   :  { %1631 = vmatpush3.bf16.msra.mxu1 %v1809_v52  ;;  %v1838_v52 = vld [vmem:[#allocation8 + $0x158] sm:$0xff]  }
  0x84   :  { %1632 = vmatprep.subr.bf16.mxu1 %v1811_v53  ;;  %v1839_v53 = vld [vmem:[#allocation8 + $0x1e8] sm:$0xff]  }
  0x87   :  { %1633 = vmatpush3.bf16.msra.mxu1 %v1813_v54 }
  0x88   :  { %1634 = vmatprep.subr.bf16.mxu1 %v1815_v56 }
  0x8b   :  { %1635 = vmatpush3.bf16.msra.mxu1 %v1817_v58  ;;  %v1841_v58 = vld [vmem:[#allocation8 + $0x1a8] sm:$0xff]  }
  0x8c   :  { %1636 = vmatprep.subr.bf16.mxu1 %v1819_v60  ;;  %v182_v60 = vrot.slane %v2177_v8, %v181_v51 }
  0x8f   :  { %1637 = vmatpush3.bf16.msra.mxu1 %v1821_v62  ;;  %v1842_v62 = vld [vmem:[#allocation8 + $0x150] sm:$0xff]  }
  0x90   :  { %1638 = vmatprep.subr.bf16.mxu1 %v1822_v63  ;;  %v1843_v63 = vld [vmem:[#allocation8 + $0x1e0] sm:$0xff]  }
  0x93   :  { %1639 = vmatpush3.bf16.msra.mxu1 %v1824_v1 }
  0x94   :  { %1640 = vmatprep.subr.bf16.mxu1 %v1826_v2  ;;  %v1844_v2 = vld [vmem:[#allocation8 + $0x110] sm:$0xff]  }
  0x97   :  { %1641 = vmatpush3.bf16.msra.mxu1 %v1828_v3  ;;  %v1845_v3 = vld [vmem:[#allocation8 + $0x1a0] sm:$0xff]  }
  0x98   :  { %1670 = vmatprep.subr.bf16.mxu1 %v1831_v4 }
 0x122   :  { %v309_v12 = vpop.f32.mrf.mxu1 }
 0x123   :  { %v310_v13 = vadd.f32 %v309_v12, %v154_v10 }
 0x124   :  { %v311_v15 = vpop.f32.mrf.mxu1 }
 0x125   :  { %v312_v16 = vadd.f32 %v311_v15, %v158_v11  ;;  %v439_v18 = vmax.f32 %v310_v13, 0.0  ;;  %v1848_v13 = vld [vmem:[#allocation8 + $0x108] sm:$0xff]  }
 0x126   :  { %v313_v19 = vpop.f32.mrf.mxu1 }
 0x127   :  { %v440_v21 = vmax.f32 %v312_v16, 0.0  ;;  %v447_v26 = vpack.c.bf16 %v439_v18, %v439_v18  ;;  %v1850_v18 = vld [vmem:[#allocation8 + $0x140] sm:$0xff]   ;;  %v1851_v19 = vld [vmem:[#allocation8 + $0x1d0] sm:$0xff]  }
 0x128   :  { %v314_v22 = vpop.f32.mrf.mxu1 }
 0x129   :  { %v448_v23 = vpack.c.bf16 %v440_v21, %v440_v21  ;;  %v1853_v21 = vld [vmem:[#allocation8 + $0x190] sm:$0xff]  }
 0x12a   :  { %v350_v27 = vpop.f32.mrf.mxu1 }
 0x12b   :  { %v351_v29 = vadd.f32 %v350_v27, %v162_v20  ;;  %1006 = vmatprep.mubr.bf16.mxu0 %v448_v23  ;;  %v1852_v20 = vld [vmem:[#allocation8 + $0x100] sm:$0xff]   ;;  %v178_v23 = vrot.slane %v2177_v8, %v177_v17  ;;  %v2064_v8 = vmov 0.0   ;;  %v1879_v17 = vld [vmem:[#allocation13 + $0x10] sm:$0xff]  }
 0x12c   :  { %v352_v30 = vpop.f32.mrf.mxu1  ;;  %1007 = vmatmul.mubr.bf16.vlgmr.msra.gmra.mxu0 %v447_v26 }
 0x12d   :  { %v353_v31 = vadd.f32 %v352_v30, %v166_v24  ;;  %1649 = vmatpush3.bf16.msra.mxu0 %v1825_v25  ;;  %v441_v34 = vmax.f32 %v351_v29, 0.0  ;;  %v1854_v24 = vld [vmem:[#allocation8 + $0x1c8] sm:$0xff]  }
 0x12e   :  { %v354_v35 = vpop.f32.mrf.mxu1  ;;  %1650 = vmatprep.subr.bf16.mxu0 %v1827_v28  ;;  %v1855_v25 = vld [vmem:[#allocation8 + $0x188] sm:$0xff]   ;;  %v1857_v28 = vld [vmem:[#allocation8 + $0x180] sm:$0xff]  }
 0x12f   :  { %v442_v37 = vmax.f32 %v353_v31, 0.0  ;;  %v449_v43 = vpack.c.bf16 %v441_v34, %v441_v34  ;;  %v1858_v31 = vld [vmem:[#allocation10 + $0x38] sm:$0xff]   ;;  %v1861_v34 = vld [vmem:[#allocation10 + $0x20] sm:$0xff]  }
 0x130   :  { %v355_v38 = vpop.f32.mrf.mxu1  ;;  %v1862_v35 = vld [vmem:[#allocation10 + $0x18] sm:$0xff]  }
 0x131   :  { %v450_v39 = vpack.c.bf16 %v442_v37, %v442_v37  ;;  %1651 = vmatpush3.bf16.msra.mxu0 %v1829_v32  ;;  %v1859_v32 = vld [vmem:[#allocation10 + $0x30] sm:$0xff]   ;;  %v1864_v37 = vld [vmem:[#allocation10 + $0x8] sm:$0xff]   ;;  %v1865_v38 = vld [vmem:[#allocation10] sm:$0xff]  }
 0x132   :  { %1652 = vmatprep.subr.bf16.mxu0 %v1830_v36  ;;  %v391_v46 = vpop.f32.mrf.mxu1  ;;  %v1863_v36 = vld [vmem:[#allocation10 + $0x10] sm:$0xff]  }
 0x133   :  { %1046 = vmatprep.mubr.bf16.mxu1 %v450_v39  ;;  %v392_v16 = vadd.f32 %v391_v46, %v170_v5  ;;  %v1866_v39 = vld [vmem:[#allocation11 + $0x38] sm:$0xff]  }
 0x134   :  { %1047 = vmatmul.mubr.bf16.vlgmr.msra.gmra.mxu1 %v449_v43  ;;  %v393_v47 = vpop.f32.mrf.mxu1  ;;  %v1870_v43 = vld [vmem:[#allocation11 + $0x18] sm:$0xff]  }
 0x135   :  { %1653 = vmatpush3.bf16.msra.mxu0 %v1832_v40  ;;  %1671 = vmatpush3.bf16.msra.mxu1 %v1833_v41  ;;  %v394_v50 = vadd.f32 %v393_v47, %v174_v42  ;;  %v443_v22 = vmax.f32 %v392_v16, 0.0  ;;  %v1867_v40 = vld [vmem:[#allocation11 + $0x30] sm:$0xff]   ;;  %v1868_v41 = vld [vmem:[#allocation11 + $0x28] sm:$0xff]   ;;  %v1869_v42 = vld [vmem:[#allocation11 + $0x20] sm:$0xff]  }
 0x136   :  { %1654 = vmatprep.subr.bf16.mxu0 %v1834_v44  ;;  %1672 = vmatprep.subr.bf16.mxu1 %v1835_v45  ;;  %v395_v54 = vpop.f32.mrf.mxu1  ;;  %v1871_v44 = vld [vmem:[#allocation11 + $0x10] sm:$0xff]   ;;  %v1878_v16 = vld [vmem:[#allocation13 + $0x18] sm:$0xff]  }
 0x137   :  { %v444_v55 = vmax.f32 %v394_v50, 0.0  ;;  %v451_v26 = vpack.c.bf16 %v443_v22, %v443_v22 }
 0x138   :  { %v396_v56 = vpop.f32.mrf.mxu1 }
 0x139   :  { %1655 = vmatpush3.bf16.msra.mxu0 %v1836_v48  ;;  %1673 = vmatpush3.bf16.msra.mxu1 %v1837_v49  ;;  %v452_v59 = vpack.c.bf16 %v444_v55, %v444_v55  ;;  %v1512_v56 = vld [vmem:[%s2243_s4] ss:$0 sm:$0xff] }
 0x13a   :  { %1656 = vmatprep.subr.bf16.mxu0 %v1838_v52  ;;  %1674 = vmatprep.subr.bf16.mxu1 %v1839_v53  ;;  %v432_v0 = vpop.f32.mrf.mxu1 }
 0x13b   :  { %1086 = vmatprep.mubr.bf16.mxu0 %v452_v59  ;;  %v433_v27 = vadd.f32 %v432_v0, %v178_v23 }
 0x13c   :  { %v434_v1 = vpop.f32.mrf.mxu1 }
 0x13d   :  { %1657 = vmatpush3.bf16.msra.mxu0 %v1840_v57  ;;  %1675 = vmatpush3.bf16.msra.mxu1 %v1841_v58  ;;  %v435_v4 = vadd.f32 %v434_v1, %v182_v60  ;;  %v445_v29 = vmax.f32 %v433_v27, 0.0  ;;  %v1881_v27 = vld [vmem:[#allocation13] sm:$0xff]  }
 0x13e   :  { %1658 = vmatprep.subr.bf16.mxu0 %v1842_v62  ;;  %1676 = vmatprep.subr.bf16.mxu1 %v1843_v63  ;;  %v436_v10 = vpop.f32.mrf.mxu1 }
 0x13f   :  { %v446_v11 = vmax.f32 %v435_v4, 0.0  ;;  %v453_v30 = vpack.c.bf16 %v445_v29, %v445_v29  ;;  %v1872_v10 = vld [vmem:[#allocation11 + $0x8] sm:$0xff]  }
 0x140   :  { %v437_v12 = vpop.f32.mrf.mxu1 }
 0x141   :  { %1659 = vmatpush3.bf16.msra.mxu0 %v1844_v2  ;;  %1677 = vmatpush3.bf16.msra.mxu1 %v1845_v3  ;;  %v454_v15 = vpack.c.bf16 %v446_v11, %v446_v11  ;;  %v1873_v11 = vld [vmem:[#allocation11] sm:$0xff]   ;;  %v1874_v12 = vld [vmem:[#allocation13 + $0x38] sm:$0xff]  }
 0x142   :  { %1660 = vmatprep.subr.bf16.mxu0 %v1846_v7  ;;  %1678 = vmatprep.subr.bf16.mxu1 %v1847_v9 }
 0x143   :  { %1126 = vmatprep.mubr.bf16.mxu1 %v454_v15  ;;  %v1877_v15 = vld [vmem:[#allocation13 + $0x20] sm:$0xff]  }
 0x145   :  { %1661 = vmatpush3.bf16.msra.mxu0 %v1848_v13  ;;  %1679 = vmatpush3.bf16.msra.mxu1 %v1849_v14  ;;  %v1875_v13 = vld [vmem:[#allocation13 + $0x30] sm:$0xff]   ;;  %v1876_v14 = vld [vmem:[#allocation13 + $0x28] sm:$0xff]  }
 0x146   :  { %1662 = vmatprep.subr.bf16.mxu0 %v1850_v18  ;;  %1680 = vmatprep.subr.bf16.mxu1 %v1851_v19  ;;  %v1577_v18 = vld [vmem:[%s2245_s6] ss:$0 sm:$0xff] }
 0x149   :  { %1663 = vmatpush3.bf16.msra.mxu0 %v1852_v20  ;;  %1681 = vmatpush3.bf16.msra.mxu1 %v1853_v21 }
 0x14a   :  { %1682 = vmatprep.subr.bf16.mxu1 %v1854_v24  ;;  %1719 = vmatprep.subr.bf16.mxu0 %v2064_v8 }
 0x14c   :  { %1087 = vmatmul.mubr.bf16.vlgmr.msra.gmra.mxu0 %v451_v26  ;;  %v1880_v26 = vld [vmem:[#allocation13 + $0x8] sm:$0xff]  }
 0x14d   :  { %1683 = vmatpush3.bf16.msra.mxu1 %v1855_v25  ;;  %1720 = vmatpush3.bf16.msra.mxu0 %v1858_v31 }
 0x14e   :  { %1684 = vmatprep.subr.bf16.mxu1 %v1856_v6  ;;  %1721 = vmatprep.subr.bf16.mxu0 %v2064_v8  ;;  %v1586_v6 = vld [vmem:[%s2247_s8] ss:$0 sm:$0xff]  ;;  %s2022_s8 = scalar_lea.vmem %s1481_s17, 128 }
 0x14f   :  { %1735 = vmatprep.mubr.msk.bf16.mxu0 %vm2065_vm1, %v2064_v8  ;;  %p2023_p7 = scmp.ne.s32.totalorder %s1481_s17, %s2022_s8  ;;  %p2028_p9 = scmp.lt.s32.totalorder %s2022_s8, %s2022_s8 }
 0x151   :  { %1685 = vmatpush3.bf16.msra.mxu1 %v1857_v28  ;;  %1722 = vmatpush3.bf16.msra.mxu0 %v1859_v32  ;;  %p2029_p10 = por %p2028_p9, %p2027_p8 }
 0x152   :  { %1739 = vmatprep.subr.bf16.mxu1 %v2064_v8  ;;  %1723 = vmatprep.subr.bf16.mxu0 %v2064_v8 }
 0x153   :  { %p2030_p11 = pnand %p2029_p10, %p2023_p7 }
 0x154   :  { %1127 = vmatmul.mubr.bf16.vlgmr.msra.gmra.mxu1 %v453_v30 }
 0x155   :  { %1724 = vmatpush3.bf16.msra.mxu0 %v1860_v33  ;;  %1755 = vmatprep.mubr.msk.bf16.mxu1 %vm2065_vm1, %v2064_v8 }
 0x156   :  { %1725 = vmatprep.subr.bf16.mxu0 %v2064_v8  ;;  %1740 = vmatpush3.bf16.msra.mxu1 %v1866_v39 }
 0x157   :  { %1741 = vmatprep.subr.bf16.mxu1 %v2064_v8 }
 0x159   :  { %1726 = vmatpush3.bf16.msra.mxu0 %v1861_v34 }
 0x15a   :  { %1727 = vmatprep.subr.bf16.mxu0 %v2064_v8  ;;  %1742 = vmatpush3.bf16.msra.mxu1 %v1867_v40 }
 0x15b   :  { %1743 = vmatprep.subr.bf16.mxu1 %v2064_v8 }
 0x15d   :  { %1728 = vmatpush3.bf16.msra.mxu0 %v1862_v35  ;;  %v1595_v35 = vld [vmem:[%s2249_s10] ss:$0 sm:$0xff] }
 0x15e   :  { %1729 = vmatprep.subr.bf16.mxu0 %v2064_v8  ;;  %1744 = vmatpush3.bf16.msra.mxu1 %v1868_v41 }
 0x15f   :  { %1745 = vmatprep.subr.bf16.mxu1 %v2064_v8 }
 0x161   :  { %1730 = vmatpush3.bf16.msra.mxu0 %v1863_v36 }
 0x162   :  { %1731 = vmatprep.subr.bf16.mxu0 %v2064_v8  ;;  %1746 = vmatpush3.bf16.msra.mxu1 %v1869_v42 }
 0x163   :  { %1747 = vmatprep.subr.bf16.mxu1 %v2064_v8 }
 0x165   :  { %1732 = vmatpush3.bf16.msra.mxu0 %v1864_v37 }
 0x166   :  { %1733 = vmatprep.subr.bf16.mxu0 %v2064_v8  ;;  %1748 = vmatpush3.bf16.msra.mxu1 %v1870_v43 }
 0x167   :  { %1749 = vmatprep.subr.bf16.mxu1 %v2064_v8 }
 0x169   :  { %1734 = vmatpush3.bf16.msra.mxu0 %v1865_v38 }
 0x16a   :  { %1759 = vmatprep.subr.bf16.mxu0 %v2064_v8  ;;  %1750 = vmatpush3.bf16.msra.mxu1 %v1871_v44 }
 0x16b   :  { %1751 = vmatprep.subr.bf16.mxu1 %v2064_v8 }
 0x16e   :  { %1752 = vmatpush3.bf16.msra.mxu1 %v1872_v10 }
 0x16f   :  { %1753 = vmatprep.subr.bf16.mxu1 %v2064_v8 }
 0x172   :  { %1754 = vmatpush3.bf16.msra.mxu1 %v1873_v11 }
 0x1ec   :  { %v1620_v45 = vpop.f32.mrf.mxu0 }
 0x1ee   :  { %v1621_v46 = vpop.f32.mrf.mxu0 }
 0x1ef   :  { %v1622_v55 = vadd.f32 %v1621_v46, %v1620_v45 }
 0x1f0   :  { %v1623_v47 = vpop.f32.mrf.mxu0 }
 0x1f1   :  { %v1009_v60 = vadd.f32 %v1622_v55, %v1512_v56 }
 0x1f2   :  { %v1624_v48 = vpop.f32.mrf.mxu0 }
 0x1f4   :  { %v1642_v49 = vpop.f32.mrf.mxu1 }
 0x1f6   :  { %v1643_v50 = vpop.f32.mrf.mxu1 }
 0x1f7   :  { %v1644_v58 = vadd.f32 %v1643_v50, %v1642_v49 }
 0x1f8   :  { %v1645_v51 = vpop.f32.mrf.mxu1 }
 0x1f9   :  { %v1049_v63 = vadd.f32 %v1644_v58, %v1009_v60 }
 0x1fa   :  { %v1646_v52 = vpop.f32.mrf.mxu1 }
 0x20c   :  { %v1664_v53 = vpop.f32.mrf.mxu0 }
 0x20e   :  { %v1665_v54 = vpop.f32.mrf.mxu0 }
 0x20f   :  { %v1666_v61 = vadd.f32 %v1665_v54, %v1664_v53 }
 0x210   :  { %v1667_v57 = vpop.f32.mrf.mxu0 }
 0x211   :  { %v1089_v1 = vadd.f32 %v1666_v61, %v1049_v63 }
 0x212   :  { %v1668_v59 = vpop.f32.mrf.mxu0 }
 0x214   :  { %v1686_v62 = vpop.f32.mrf.mxu1 }
 0x216   :  { %v1687_v0 = vpop.f32.mrf.mxu1 }
 0x217   :  { %v1688_v2 = vadd.f32 %v1687_v0, %v1686_v62 }
 0x218   :  { %v1689_v3 = vpop.f32.mrf.mxu1 }
 0x219   :  { %v1129_v4 = vadd.f32 %v1688_v2, %v1089_v1 }
 0x21a   :  { %v1690_v5 = vpop.f32.mrf.mxu1 }
 0x21b   :  { %v1134_v7 = vmax.f32 %v1129_v4, 0.0 }
 0x21d   :  { %v1135_v9 = vpack.c.bf16 %v1134_v7, %v1134_v7 }
 0x21f   :  { %1736 = vmatmul.mubr.bf16.vlgmr.msra.gmra.mxu0 %v1135_v9 }
 0x220   :  { %1775 = vmatprep.mubr.msk.bf16.mxu0 %vm2065_vm1, %v2064_v8  ;;  %1760 = vmatpush3.bf16.msra.mxu0 %v1874_v12 }
 0x221   :  { %1761 = vmatprep.subr.bf16.mxu0 %v2064_v8 }
 0x224   :  { %1762 = vmatpush3.bf16.msra.mxu0 %v1875_v13 }
 0x225   :  { %1763 = vmatprep.subr.bf16.mxu0 %v2064_v8 }
 0x228   :  { %1764 = vmatpush3.bf16.msra.mxu0 %v1876_v14 }
 0x229   :  { %1765 = vmatprep.subr.bf16.mxu0 %v2064_v8 }
 0x22c   :  { %1766 = vmatpush3.bf16.msra.mxu0 %v1877_v15 }
 0x22d   :  { %1767 = vmatprep.subr.bf16.mxu0 %v2064_v8 }
 0x230   :  { %1768 = vmatpush3.bf16.msra.mxu0 %v1878_v16 }
 0x231   :  { %1769 = vmatprep.subr.bf16.mxu0 %v2064_v8 }
 0x234   :  { %1770 = vmatpush3.bf16.msra.mxu0 %v1879_v17 }
 0x235   :  { %1771 = vmatprep.subr.bf16.mxu0 %v2064_v8 }
 0x238   :  { %1772 = vmatpush3.bf16.msra.mxu0 %v1880_v26 }
 0x239   :  { %1773 = vmatprep.subr.bf16.mxu0 %v2064_v8 }
 0x23c   :  { %1774 = vmatpush3.bf16.msra.mxu0 %v1881_v27 }
 0x2df   :  { %v1241_v19 = vpop.f32.mrf.mxu0 }
 0x2e0   :  { %v1242_v20 = vadd.f32 %v1577_v18, %v1241_v19 }
 0x2e1   :  { %v1737_v21 = vpop.f32.mrf.mxu0 }
 0x2e2   :  { %v1247_v22 = vmax.f32 %v1242_v20, 0.0 }
 0x2e3   :  { %v1244_v23 = vpop.f32.mrf.mxu0 }
 0x2e4   :  { %v1248_v24 = vpack.c.bf16 %v1247_v22, %v1247_v22 }
 0x2e5   :  { %v1738_v25 = vpop.f32.mrf.mxu0 }
 0x2e6   :  { %1756 = vmatmul.mubr.bf16.vlgmr.msra.gmra.mxu1 %v1248_v24 }
 0x3a6   :  { %v1354_v28 = vpop.f32.mrf.mxu1 }
 0x3a7   :  { %v1355_v29 = vadd.f32 %v1586_v6, %v1354_v28 }
 0x3a8   :  { %v1757_v30 = vpop.f32.mrf.mxu1 }
 0x3a9   :  { %v1360_v31 = vmax.f32 %v1355_v29, 0.0 }
 0x3aa   :  { %v1357_v32 = vpop.f32.mrf.mxu1 }
 0x3ab   :  { %v1361_v33 = vpack.c.bf16 %v1360_v31, %v1360_v31 }
 0x3ac   :  { %v1758_v34 = vpop.f32.mrf.mxu1 }
 0x3ad   :  { %1776 = vmatmul.mubr.bf16.vlgmr.msra.gmra.mxu0 %v1361_v33 }
 0x46d   :  { %v1467_v8 = vpop.f32.mrf.mxu0 }
 0x46e   :  { %v1468_v36 = vadd.f32 %v1595_v35, %v1467_v8 }
 0x46f   :  { %v1777_v37 = vpop.f32.mrf.mxu0 }
 0x470   :  { %1473 = vst [vmem:[#allocation14] sm:$0xff] %v1468_v36 }
 0x471   :  { %v1470_v38 = vpop.f32.mrf.mxu0 }
 0x472   :  { %2033 = shalt.err (!%p2030_p11)
}
 0x473   :  { %1483 = dma.vmem_to_hbm [thread:$0]  %s1481_s17, 128, %s2250_s11, [#allocation4]   ;;  %v1778_v39 = vpop.f32.mrf.mxu0 }
 0x474   :  { %2050 = dma.done.wait [#allocation4], 128  }
 0x475   :  { %2051 = vsyncadd [#allocation4], 4294967168 }
 0x476   :  { %1487 = vsyncpa [#allocation3], 1 }
 0x477   :  { %1488 = vsyncpa [#allocation6], 1 }
 0x478   :  { %1489 = vsyncpa [#allocation9], 1 }
 0x479   :  { %1490 = vsyncpa [#allocation12], 1 }
 0x47a   :  { %1491 = vsyncpa [#allocation4], 1 }

</bundles_post_ra>
